<compile_context>
chip_gen: v7x
topology: tpu7x:2x2x1
jax: 0.10.0
libtpu: 0.0.40
codegen_flags: <defaults>
</compile_context>

<pallas_src>
import functools
import math

import jax
import jax.numpy as jnp
import numpy as np
from jax.experimental import pallas as pl
from jax.experimental.pallas import tpu as pltpu


def _round_up(x, m):
    return (x + m - 1) // m * m


def _patient_embedding_kernel(pk_ref, tblT_ref, out_ref, *, value_row):
    """Fused gather / concat as one (table_T @ selector) matmul, transposed.

    pk_ref   : (8, TILE_N) int32   -- row0 codes, row1 minutes+V, row2 bitcast(values)
    tblT_ref : (d_model, K_pad) f32 transposed combined table (resident)
    out_ref  : (d_model, TILE_N) f32 transposed output tile (tokens on lanes)
    """
    k_pad = tblT_ref.shape[1]
    tile_n = out_ref.shape[1]

    packed = pk_ref[...]                                  # (8, TILE_N) int32
    codes = packed[0:1, :]                                # (1, TILE_N)
    minutes = packed[1:2, :]                              # (1, TILE_N), already +V
    vals = pltpu.bitcast(packed[2:3, :], jnp.float32)     # (1, TILE_N) f32, exact

    # Transposed selector: rows = combined-table index k, columns = tokens.
    # Code one-hot and minute one-hot hit disjoint row ranges, so OR is exact.
    row = jax.lax.broadcasted_iota(jnp.int32, (k_pad, tile_n), 0)
    sel = ((row == codes) | (row == minutes)).astype(jnp.float32)

    # One MXU matmul -> (d_model, TILE_N); pinned precision keeps rows exact f32.
    acc = jnp.dot(tblT_ref[...], sel,
                  preferred_element_type=jnp.float32,
                  precision=jax.lax.Precision.HIGHEST)

    # Drop the raw `values` into output feature-row E (never touches the MXU),
    # then one full-width unmasked store.
    ridx = jax.lax.broadcasted_iota(jnp.int32, acc.shape, 0)
    out_ref[...] = jnp.where(ridx == value_row, vals, acc)


def patient_embedding(codes, values, minutes, emb_table, pe_table, *,
                      tile_n=2048):
    """codes/minutes: (B, L) int; values: (B, L) f32 -> (B, L, d_model) f32."""
    B, L = codes.shape
    V, E = emb_table.shape
    T, D = pe_table.shape
    d_model = 2 * D
    assert E == D - 1

    N = B * L
    # Lane-dense token tiles: TILE_N is a multiple of 128; keep >=2 tiles when
    # possible so v7x's two TensorCores both get work.
    TILE_N = max(128, min(_round_up(tile_n, 128), _round_up(N, 128)))
    while TILE_N > 128 and _round_up(N, TILE_N) // TILE_N < 2:
        TILE_N = _round_up(TILE_N // 2, 128)
    N_pad = _round_up(N, TILE_N)

    # Combined, pre-transposed gather table: (d_model, K_pad)
    #   cols [0, V)     : embedding rows     -> output features [0, E)
    #   cols [V, V+T)   : positional rows    -> output features [D, 2D)
    #   output feature E (the value column) is all-zero here; filled in-kernel.
    K = V + T
    K_pad = _round_up(K, 8)
    tblT = jnp.zeros((d_model, K_pad), jnp.float32)
    tblT = tblT.at[:E, :V].set(emb_table.T.astype(jnp.float32))
    tblT = tblT.at[D:, V:V + T].set(pe_table.T.astype(jnp.float32))

    # Single lane-dense packed input stream (8, N_pad) int32.
    # NOTE: out-of-range codes/minutes silently yield a zero contribution
    # instead of raising like nn.Embedding; padded token columns are discarded
    # by the final [:N] slice.
    codes_f = codes.reshape(N).astype(jnp.int32)
    minutes_f = minutes.reshape(N).astype(jnp.int32) + V
    val_bits = jax.lax.bitcast_convert_type(
        values.reshape(N).astype(jnp.float32), jnp.int32)
    packed = jnp.zeros((8, N_pad), jnp.int32)
    packed = packed.at[0, :N].set(codes_f)
    packed = packed.at[1, :N].set(minutes_f)
    packed = packed.at[2, :N].set(val_bits)

    grid = (N_pad // TILE_N,)
    cost = pl.CostEstimate(
        flops=2 * N_pad * K_pad * d_model,
        transcendentals=0,
        bytes_accessed=packed.size * 4 + tblT.size * 4 + d_model * N_pad * 4,
    )

    out_t = pl.pallas_call(
        functools.partial(_patient_embedding_kernel, value_row=E),
        out_shape=jax.ShapeDtypeStruct((d_model, N_pad), jnp.float32),
        grid_spec=pltpu.PrefetchScalarGridSpec(
            num_scalar_prefetch=0,
            grid=grid,
            in_specs=[
                pl.BlockSpec((8, TILE_N), lambda i: (0, i)),        # packed scalars
                pl.BlockSpec((d_model, K_pad), lambda i: (0, 0)),   # resident table
            ],
            out_specs=pl.BlockSpec((d_model, TILE_N), lambda i: (0, i)),
        ),
        compiler_params=pltpu.CompilerParams(
            dimension_semantics=("parallel",),      # shard tiles across v7x's 2 TCs
            vmem_limit_bytes=32 * 1024 * 1024,
        ),
        cost_estimate=cost,
    )(packed, tblT)

    # Layout plumbing back to (B, L, d_model).
    return out_t[:, :N].T.reshape(B, L, d_model)


def init_params(d_model, max_len, num_tokenizer_codes, key):
    """Deterministic parameter construction mirroring the PyTorch __init__."""
    assert d_model % 2 == 0
    D = d_model // 2

    # Sinusoidal time encoding (max_len, D)
    position = jnp.arange(max_len, dtype=jnp.float32)[:, None]
    div_term = jnp.exp(jnp.arange(0, D, 2, dtype=jnp.float32)
                       * (-math.log(10000.0) / D))
    pe = jnp.zeros((max_len, D), dtype=jnp.float32)
    pe = pe.at[:, 0::2].set(jnp.sin(position * div_term))
    pe = pe.at[:, 1::2].set(jnp.cos(position * div_term))

    # Embedding table: xavier_uniform over (vocab, D-1).
    # (PyTorch calls xavier_uniform_ AFTER construction, so the padding_idx=0
    #  row is NOT zero; we reproduce that.)
    vocab = 1 + num_tokenizer_codes
    embed_dim = D - 1
    bound = math.sqrt(6.0 / (vocab + embed_dim))
    emb = jax.random.uniform(key, (vocab, embed_dim), jnp.float32,
                             minval=-bound, maxval=bound)
    return emb, pe


def reference(codes, values, minutes, emb_table, pe_table):
    """Pure-JAX reference mirroring the PyTorch forward."""
    code_emb = emb_table[codes]                                       # (B,L,D-1)
    value_emb = jnp.concatenate(
        [code_emb, values[..., None].astype(jnp.float32)], axis=-1)   # (B,L,D)
    time_emb = pe_table[minutes]                                      # (B,L,D)
    return jnp.concatenate([value_emb, time_emb], axis=-1)            # (B,L,2D)


if __name__ == "__main__":
    d_model = 32          # -> internal D = 16, embed_dim = 15
    max_len = 180
    num_tokenizer_codes = 20   # vocab = 21
    vocab = 1 + num_tokenizer_codes

    key = jax.random.PRNGKey(0)
    k_emb, k1, k2, k3, k4, k5, k6 = jax.random.split(key, 7)
    emb_table, pe_table = init_params(d_model, max_len, num_tokenizer_codes, k_emb)

    # --- Test 1: tiny batch, single grid step ---------------------------------
    B, L = 2, 8
    codes = jax.random.randint(k1, (B, L), 0, vocab, dtype=jnp.int32)
    minutes = jax.random.randint(k2, (B, L), 0, max_len, dtype=jnp.int32)
    values = jax.random.normal(k3, (B, L), dtype=jnp.float32)

    out = jax.block_until_ready(
        patient_embedding(codes, values, minutes, emb_table, pe_table))
    ref = reference(codes, values, minutes, emb_table, pe_table)
    np.testing.assert_allclose(np.asarray(out), np.asarray(ref),
                               rtol=1e-5, atol=1e-5)
    assert out.shape == (B, L, d_model)

    # --- Test 2: exercises the token-axis grid + padding (N=240 -> 2x128 tiles)
    B2, L2 = 4, 60
    codes2 = jax.random.randint(k4, (B2, L2), 0, vocab, dtype=jnp.int32)
    minutes2 = jax.random.randint(k5, (B2, L2), 0, max_len, dtype=jnp.int32)
    values2 = jax.random.normal(k6, (B2, L2), dtype=jnp.float32)

    out2 = jax.block_until_ready(
        patient_embedding(codes2, values2, minutes2, emb_table, pe_table,
                          tile_n=128))
    ref2 = reference(codes2, values2, minutes2, emb_table, pe_table)
    np.testing.assert_allclose(np.asarray(out2), np.asarray(ref2),
                               rtol=1e-5, atol=1e-5)
    assert out2.shape == (B2, L2, d_model)

    print("KERNEL_OK")
</pallas_src>

<mosaic_0001>
module attributes {stable_mosaic.version = 11 : i64} {
  func.func @_patient_embedding_kernel(%arg0: i32, %arg1: memref<8x128xi32, #tpu.memory_space<vmem>>, %arg2: memref<32x208xf32, #tpu.memory_space<vmem>>, %arg3: memref<32x128xf32, #tpu.memory_space<vmem>>) attributes {dimension_semantics = [#tpu.dimension_semantics<parallel>], iteration_bounds = array<i64: 1>, scalar_prefetch = 0 : i64, scratch_operands = 0 : i64, tpu.core_type = #tpu.core_type<tc>, window_params = [{transform_indices = @transform_0, window_bounds = array<i64: 8, 128>}, {pipeline_mode = #tpu.pipeline_mode<synchronous>, transform_indices = @transform_1, window_bounds = array<i64: 32, 208>}, {transform_indices = @transform_2, window_bounds = array<i64: 32, 128>}]} {
    %c0 = arith.constant 0 : index
    %c0_0 = arith.constant 0 : index
    %0 = vector.load %arg1[%c0, %c0_0] : memref<8x128xi32, #tpu.memory_space<vmem>>, vector<8x128xi32>
    %1 = vector.extract_strided_slice %0 {offsets = [0, 0], sizes = [1, 128], strides = [1, 1]} : vector<8x128xi32> to vector<1x128xi32>
    %2 = vector.extract_strided_slice %0 {offsets = [1, 0], sizes = [1, 128], strides = [1, 1]} : vector<8x128xi32> to vector<1x128xi32>
    %3 = vector.extract_strided_slice %0 {offsets = [2, 0], sizes = [1, 128], strides = [1, 1]} : vector<8x128xi32> to vector<1x128xi32>
    %4 = tpu.bitcast %3 : vector<1x128xi32> -> vector<1x128xf32>
    %5 = tpu.iota {dimensions = array<i32: 0>} : vector<208x128xi32>
    %6 = vector.broadcast %1 : vector<1x128xi32> to vector<208x128xi32>
    %7 = arith.cmpi eq, %5, %6 : vector<208x128xi32>
    %8 = vector.broadcast %2 : vector<1x128xi32> to vector<208x128xi32>
    %9 = arith.cmpi eq, %5, %8 : vector<208x128xi32>
    %10 = arith.ori %7, %9 : vector<208x128xi1>
    %11 = arith.extui %10 : vector<208x128xi1> to vector<208x128xi32>
    %12 = arith.sitofp %11 : vector<208x128xi32> to vector<208x128xf32>
    %c0_1 = arith.constant 0 : index
    %c0_2 = arith.constant 0 : index
    %13 = vector.load %arg2[%c0_1, %c0_2] : memref<32x208xf32, #tpu.memory_space<vmem>>, vector<32x208xf32>
    %cst = arith.constant dense<0.000000e+00> : vector<32x128xf32>
    %14 = tpu.matmul %13, %12, %cst {dimension_numbers = #tpu.dot_dimension_numbers<[1], [0], [0], [1], [0, 0, 1, 1], [], []>, precision = #tpu.contract_precision<fp32>} : vector<32x208xf32>, vector<208x128xf32>, vector<32x128xf32> -> vector<32x128xf32>
    %15 = tpu.iota {dimensions = array<i32: 0>} : vector<32x128xi32>
    %c15_i32 = arith.constant 15 : i32
    %16 = vector.broadcast %c15_i32 : i32 to vector<32x128xi32>
    %17 = arith.cmpi eq, %15, %16 : vector<32x128xi32>
    %18 = vector.shape_cast %4 : vector<1x128xf32> to vector<1x128xf32>
    %19 = vector.broadcast %18 : vector<1x128xf32> to vector<32x128xf32>
    %20 = arith.select %17, %19, %14 : vector<32x128xi1>, vector<32x128xf32>
    %c0_3 = arith.constant 0 : index
    %c0_4 = arith.constant 0 : index
    %21 = vector.load %arg3[%c0_3, %c0_4] : memref<32x128xf32, #tpu.memory_space<vmem>>, vector<32x128xf32>
    tpu.vector_store %arg3[%c0_3, %c0_4], %20 {strides = array<i32>} : memref<32x128xf32, #tpu.memory_space<vmem>>, vector<32x128xf32>,
    return
  }
  func.func @transform_0(%arg0: i32) -> (i32, i32) {
    %c0_i32 = arith.constant 0 : i32
    %c0_i32_0 = arith.constant 0 : i32
    return %c0_i32, %arg0 : i32, i32
  }
  func.func @transform_1(%arg0: i32) -> (i32, i32) {
    %c0_i32 = arith.constant 0 : i32
    %c0_i32_0 = arith.constant 0 : i32
    %c0_i32_1 = arith.constant 0 : i32
    return %c0_i32, %c0_i32_0 : i32, i32
  }
  func.func @transform_2(%arg0: i32) -> (i32, i32) {
    %c0_i32 = arith.constant 0 : i32
    %c0_i32_0 = arith.constant 0 : i32
    return %c0_i32, %arg0 : i32, i32
  }
}

</mosaic_0001>

<bundles_post_ra>
// kernel: tpu_custom_call.1
= control target key start
LH: loop header
LB: loop body
LE: loop exit
PB: predicated region body
PF: predicated region fallthrough
CT: control target
= control target key end

     0   :  { %7 = vsyncpa [#allocation3], 0  ;;  %s2637_s0 = inlined_call_operand.hbm [shape: s32[8,128], index: 0, kind: input, shape index: {}]   ;;  %s2638_s1 = inlined_call_operand.hbm [shape: f32[32,208], index: 1, kind: input, shape index: {}]   ;;  %s2639_s2 = inlined_call_operand.hbm [shape: f32[32,128], index: 2, kind: output, shape index: {}]  }
   0x1   :  { %8 = vsyncpa [#allocation6], 0 }
   0x2   :  { %9 = vsyncpa [#allocation4], 0  ;;  %s1669_s9 = smov [#allocation2]   ;;  %s1670_s11 = smov [#allocation5]  }
   0x3   :  { %s16_s10 = sshll.u32 %s1669_s9, 4  ;;  %s25_s12 = sshll.u32 %s1670_s11, 4  ;;  %s17_s10 = int_to_ptr.vmem [resolvable:$true] %s16_s10  ;;  %s1694_s12 = int_to_ptr.vmem [resolvable:$true] %s25_s12 }
   0x4   :  { %s1597_s15 = scalar_lea.hbm %s2637_s0, 128 }
   0x5   :  { %p1598_p0 = scmp.ne.s32.totalorder %s2637_s0, %s1597_s15  ;;  %p1601_p1 = scmp.lt.u32.totalorder %s1597_s15, %s2637_s0 }
   0x7   :  { %p1603_p2 = pnand %p1601_p1, %p1598_p0 }
   0x9   :  { %1606 = shalt.err (!%p1603_p2)
}
   0xa   :  { %s1607_s20 = scalar_lea.vmem %s17_s10, 128  ;;  %p1612_p4 = scmp.lt.s32.totalorder %s17_s10, %s17_s10 }
   0xb   :  { %p1608_p3 = scmp.ne.s32.totalorder %s17_s10, %s1607_s20  ;;  %p1613_p5 = scmp.lt.s32.totalorder %s1607_s20, %s1607_s20 }
   0xd   :  { %p1614_p6 = por %p1613_p5, %p1612_p4 }
   0xf   :  { %p1615_p7 = pnand %p1614_p6, %p1608_p3 }
  0x11   :  { %1618 = shalt.err (!%p1615_p7)
}
  0x12   :  { %19 = dma.hbm_to_vmem [thread:$0]  %s2637_s0, 128, %s17_s10, [#allocation3]  }
  0x13   :  { %s1619_s25 = scalar_lea.hbm %s2638_s1, 1024 }
  0x14   :  { %p1620_p8 = scmp.ne.s32.totalorder %s2638_s1, %s1619_s25  ;;  %p1623_p9 = scmp.lt.u32.totalorder %s1619_s25, %s2638_s1 }
  0x16   :  { %p1625_p10 = pnand %p1623_p9, %p1620_p8 }
  0x18   :  { %1628 = shalt.err (!%p1625_p10)
}
  0x19   :  { %s1629_s30 = scalar_lea.vmem %s1694_s12, 1024  ;;  %p1634_p12 = scmp.lt.s32.totalorder %s1694_s12, %s1694_s12 }
  0x1a   :  { %p1630_p11 = scmp.ne.s32.totalorder %s1694_s12, %s1629_s30  ;;  %p1635_p13 = scmp.lt.s32.totalorder %s1629_s30, %s1629_s30 }
  0x1c   :  { %p1636_p0 = por %p1635_p13, %p1634_p12 }
  0x1e   :  { %p1637_p1 = pnand %p1636_p0, %p1630_p11 }
  0x20   :  { %1640 = shalt.err (!%p1637_p1)
}
  0x21   :  { %s1671_s0 = smov 256   ;;  %s1672_s3 = smov 16  }
  0x22   :  { %31 = dma.hbm_to_vmem [thread:$0]  %s2638_s1, 1024, %s1694_s12, [#allocation6], %s1671_s0, %s1671_s0, %s1672_s3  }
  0x23   :  { %1663 = dma.done.wait [#allocation3], 128  }
  0x24   :  { %1664 = vsyncadd [#allocation3], 4294967168 }
  0x25   :  { %1665 = dma.done.wait [#allocation6], 1024  }
  0x26   :  { %1666 = vsyncadd [#allocation6], 4294966272  ;;  %v40_v0 = vlaneseq  ;;  %v2668_v1 = vmov 0.0|0.0   ;;  %v38_v6 = vld [vmem:[#allocation2] sm:$0xff]  ;;  %v2704_v15 = vmov 0  ;;  %v2708_v20 = vmov 0 }
  0x27   :  { %1316 = vmatprep.subr.bf16.mxu1 %v2668_v1  ;;  %1433 = vmatprep.subr.bf16.mxu0 %v2668_v1  ;;  %v2672_v17 = vmov 1.0|1.0   ;;  %v2710_v21 = vmov 0  ;;  %v2712_v23 = vmov 0  ;;  %v2714_v25 = vmov 0  ;;  %v206_v46 = vld [vmem:[#allocation5 + $0x8] sm:$0xff] }
  0x28   :  { %v1727_v2 = vshrl.u32 %v40_v0, 7  ;;  %v2716_v26 = vmov 0  ;;  %v2719_v28 = vmov 0  ;;  %v2721_v30 = vmov 0  ;;  %v207_v44 = vld [vmem:[#allocation5 + $0x10] sm:$0xff]  ;;  %s1676_s1 = smov [#allocation7]  }
  0x29   :  { %v2723_v31 = vmov 0  ;;  %v2726_v32 = vmov 0  ;;  %v2728_v33 = vmov 0  ;;  %v2730_v35 = vmov 0  ;;  %s1199_s6 = sshll.u32 %s1676_s1, 4  ;;  %s1200_s6 = int_to_ptr.vmem [resolvable:$true] %s1199_s6 }
  0x2a   :  { %2698 = vst [vmem:[#allocation11_spill] sm:$0xff] %v1727_v2  ;;  %v69_v3 = vsub.s32 0, %v1727_v2  ;;  %v99_v4 = vsub.s32 1, %v1727_v2  ;;  %v1732_v5 = vadd.s32 8, %v1727_v2  ;;  %v43_v7 = vadd.s32 16, %v1727_v2  ;;  %s1641_s7 = scalar_lea.vmem %s1200_s6, 512  ;;  %p1646_p3 = scmp.lt.s32.totalorder %s1200_s6, %s1200_s6 }
  0x2b   :  { %v44_v10 = vadd.s32 24, %v1727_v2  ;;  %v45_v11 = vadd.s32 32, %v1727_v2  ;;  %v46_v13 = vadd.s32 40, %v1727_v2  ;;  %v47_v16 = vadd.s32 48, %v1727_v2  ;;  %p1642_p2 = scmp.ne.s32.totalorder %s1200_s6, %s1641_s7  ;;  %p1647_p4 = scmp.lt.s32.totalorder %s1641_s7, %s1641_s7 }
  0x2c   :  { %2699 = vst [vmem:[#allocation12_spill] sm:$0xff] %v1732_v5  ;;  %v1735_v8 = vrot.slane %v38_v6, %v69_v3  ;;  %v1737_v9 = vrot.slane %v38_v6, %v99_v4  ;;  %v48_v19 = vadd.s32 56, %v1727_v2  ;;  %v49_v22 = vadd.s32 64, %v1727_v2 }
  0x2d   :  { %v50_v24 = vadd.s32 72, %v1727_v2  ;;  %v51_v27 = vadd.s32 80, %v1727_v2  ;;  %v52_v29 = vadd.s32 88, %v1727_v2  ;;  %v53_v34 = vadd.s32 96, %v1727_v2  ;;  %p1648_p5 = por %p1647_p4, %p1646_p3 }
  0x2e   :  { %vm71_vm0 = vcmp.eq.s32.totalorder %v1727_v2, %v1735_v8  ;;  %vm72_vm1 = vcmp.eq.s32.totalorder %v1732_v5, %v1735_v8  ;;  %vm101_vm2 = vcmp.eq.s32.totalorder %v1727_v2, %v1737_v9  ;;  %vm102_vm3 = vcmp.eq.s32.totalorder %v1732_v5, %v1737_v9 }
  0x2f   :  { %vm1749_vm4 = vmor %vm71_vm0, %vm101_vm2  ;;  %vm73_vm5 = vcmp.eq.s32.totalorder %v43_v7, %v1735_v8  ;;  %vm103_vm6 = vcmp.eq.s32.totalorder %v43_v7, %v1737_v9  ;;  %vm74_vm8 = vcmp.eq.s32.totalorder %v44_v10, %v1735_v8  ;;  %vm104_vm9 = vcmp.eq.s32.totalorder %v44_v10, %v1737_v9  ;;  %p1649_p6 = pnand %p1648_p5, %p1642_p2 }
  0x30   :  { %vm1756_vm7 = vmor %vm72_vm1, %vm102_vm3  ;;  %vm75_vm12 = vcmp.eq.s32.totalorder %v45_v11, %v1735_v8  ;;  %vm105_vm13 = vcmp.eq.s32.totalorder %v45_v11, %v1737_v9  ;;  %vm76_vm15 = vcmp.eq.s32.totalorder %v46_v13, %v1735_v8  ;;  %vm106_vm0 = vcmp.eq.s32.totalorder %v46_v13, %v1737_v9  ;;  %v205_v11 = vld [vmem:[#allocation5] sm:$0xff] }
  0x31   :  { %vm1766_vm10 = vmpackc.low %vm1756_vm7, %vm1749_vm4  ;;  %vm77_vm3 = vcmp.eq.s32.totalorder %v47_v16, %v1735_v8  ;;  %v54_v36 = vadd.s32 104, %v1727_v2  ;;  %v2733_v37 = vmov 0  ;;  %v55_v38 = vadd.s32 112, %v1727_v2 }
  0x32   :  { %v2705_v15 = vsel %vm1766_vm10, 4294967295, %v2704_v15  ;;  %1318 = vmatpush1.bf16.msk.msra.mxu1 %vm1766_vm10, %v2672_v17  ;;  %1435 = vmatpush1.bf16.msk.msra.mxu0 %vm1766_vm10, %v2672_v17  ;;  %vm1777_vm11 = vmor %vm73_vm5, %vm103_vm6  ;;  %vm107_vm5 = vcmp.eq.s32.totalorder %v47_v16, %v1737_v9  ;;  %vm80_vm10 = vcmp.eq.s32.totalorder %v50_v24, %v1735_v8  ;;  %v2735_v39 = vmov 0 }
  0x33   :  { %1319 = vmatprep.subr.bf16.mxu1 %v2668_v1  ;;  %1436 = vmatprep.subr.bf16.mxu0 %v2668_v1  ;;  %vm1786_vm14 = vmor %vm74_vm8, %vm104_vm9  ;;  %vm78_vm8 = vcmp.eq.s32.totalorder %v48_v19, %v1735_v8  ;;  %vm108_vm9 = vcmp.eq.s32.totalorder %v48_v19, %v1737_v9  ;;  %v56_v40 = vadd.s32 120, %v1727_v2  ;;  %v2737_v41 = vmov 0 }
  0x34   :  { %v2709_v20 = vsel %vm1786_vm14, 4294967295, %v2708_v20  ;;  %vm1796_vm1 = vmpackc.low %vm1786_vm14, %vm1777_vm11  ;;  %v57_v43 = vadd.s32 128, %v1727_v2  ;;  %v58_v45 = vadd.s32 136, %v1727_v2  ;;  %v2670_v48 = vmov 0.0  }
  0x35   :  { %v2711_v21 = vsel %vm1796_vm1, 4294967295, %v2710_v21  ;;  %vm1801_vm2 = vmor %vm75_vm12, %vm105_vm13  ;;  %v1212_v49 = vsel %vm1749_vm4, 1.0, %v2670_v48  ;;  %v2748_v51 = vmov 0  ;;  %v59_v53 = vadd.s32 144, %v1727_v2 }
  0x36   :  { %v2713_v23 = vsel %vm1801_vm2, 4294967295, %v2712_v23  ;;  %1321 = vmatpush1.bf16.msk.msra.mxu1 %vm1796_vm1, %v2672_v17  ;;  %1438 = vmatpush1.bf16.msk.msra.mxu0 %vm1796_vm1, %v2672_v17  ;;  %vm1814_vm6 = vmor %vm76_vm15, %vm106_vm0  ;;  %vm79_vm15 = vcmp.eq.s32.totalorder %v49_v22, %v1735_v8  ;;  %vm109_vm0 = vcmp.eq.s32.totalorder %v49_v22, %v1737_v9  ;;  %v1213_v55 = vsel %vm1756_vm7, 1.0, %v2670_v48 }
  0x37   :  { %v2715_v25 = vsel %vm1814_vm6, 4294967295, %v2714_v25  ;;  %1322 = vmatprep.subr.bf16.mxu1 %v2668_v1  ;;  %1439 = vmatprep.subr.bf16.mxu0 %v2668_v1  ;;  %vm1826_vm12 = vmpackc.low %vm1814_vm6, %vm1801_vm2  ;;  %vm110_vm6 = vcmp.eq.s32.totalorder %v50_v24, %v1737_v9  ;;  %vm116_vm2 = vcmp.eq.s32.totalorder %v56_v40, %v1737_v9  ;;  %v1972_v56 = vsub.f32 %v1212_v49, %v1212_v49 }
  0x38   :  { %v2717_v26 = vsel %vm1826_vm12, 4294967295, %v2716_v26  ;;  %vm1831_vm13 = vmor %vm77_vm3, %vm107_vm5  ;;  %v2751_v57 = vmov 0  ;;  %v60_v58 = vadd.s32 152, %v1727_v2  ;;  %v61_v60 = vadd.s32 160, %v1727_v2 }
  0x39   :  { %2718 = vst [vmem:[#allocation13_spill] sm:$0xff] %v2717_v26  ;;  %v2720_v28 = vsel %vm1831_vm13, 4294967295, %v2719_v28  ;;  %vm1838_vm1 = vmor %vm78_vm8, %vm108_vm9  ;;  %vm81_vm8 = vcmp.eq.s32.totalorder %v51_v27, %v1735_v8  ;;  %vm111_vm9 = vcmp.eq.s32.totalorder %v51_v27, %v1737_v9  ;;  %v62_v62 = vadd.s32 168, %v1727_v2 }
  0x3a   :  { %v2722_v30 = vsel %vm1838_vm1, 4294967295, %v2721_v30  ;;  %1324 = vmatpush1.bf16.msk.msra.mxu1 %vm1826_vm12, %v2672_v17  ;;  %1441 = vmatpush1.bf16.msk.msra.mxu0 %vm1826_vm12, %v2672_v17  ;;  %vm1854_vm3 = vmpackc.low %vm1838_vm1, %vm1831_vm13  ;;  %vm82_vm1 = vcmp.eq.s32.totalorder %v52_v29, %v1735_v8  ;;  %vm112_vm13 = vcmp.eq.s32.totalorder %v52_v29, %v1737_v9  ;;  %v2004_v0 = vsub.f32 %v1213_v55, %v1213_v55 }
  0x3b   :  { %v2724_v31 = vsel %vm1854_vm3, 4294967295, %v2723_v31  ;;  %1325 = vmatprep.subr.bf16.mxu1 %v2668_v1  ;;  %1442 = vmatprep.subr.bf16.mxu0 %v2668_v1  ;;  %vm1860_vm5 = vmor %vm79_vm15, %vm109_vm0  ;;  %vm83_vm0 = vcmp.eq.s32.totalorder %v53_v34, %v1735_v8  ;;  %v2664_v3 = vand.u32 4294901760, %v1972_v56  ;;  %v1214_v6 = vsel %vm1777_vm11, 1.0, %v2670_v48 }
  0x3c   :  { %2725 = vst [vmem:[#allocation14_spill] sm:$0xff] %v2724_v31  ;;  %v2727_v32 = vsel %vm1860_vm5, 4294967295, %v2726_v32  ;;  %vm1866_vm12 = vmor %vm80_vm10, %vm110_vm6  ;;  %v2760_v10 = vmov 0  ;;  %v63_v13 = vadd.s32 176, %v1727_v2  ;;  %vm2765_vm11 = vcmp.eq.s32.totalorder %v60_v58, %v1737_v9 }
  0x3d   :  { %v2729_v33 = vsel %vm1866_vm12, 4294967295, %v2728_v33  ;;  %vm1877_vm15 = vmpackc.low %vm1866_vm12, %vm1860_vm5  ;;  %vm115_vm12 = vcmp.eq.s32.totalorder %v55_v38, %v1737_v9  ;;  %v2767_v16 = vmov 0  ;;  %v64_v18 = vadd.s32 184, %v1727_v2 }
  0x3e   :  { %v2731_v35 = vsel %vm1877_vm15, 4294967295, %v2730_v35  ;;  %1327 = vmatpush1.bf16.msk.msra.mxu1 %vm1854_vm3, %v2672_v17  ;;  %1444 = vmatpush1.bf16.msk.msra.mxu0 %vm1854_vm3, %v2672_v17  ;;  %vm1888_vm10 = vmor %vm81_vm8, %vm111_vm9  ;;  %vm113_vm3 = vcmp.eq.s32.totalorder %v53_v34, %v1737_v9  ;;  %vm84_vm8 = vcmp.eq.s32.totalorder %v54_v36, %v1735_v8  ;;  %vm114_vm9 = vcmp.eq.s32.totalorder %v54_v36, %v1737_v9 }
  0x3f   :  { %2732 = vst [vmem:[#allocation15_spill] sm:$0xff] %v2731_v35  ;;  %v2734_v37 = vsel %vm1888_vm10, 4294967295, %v2733_v37  ;;  %1328 = vmatprep.subr.bf16.mxu1 %v2668_v1  ;;  %1445 = vmatprep.subr.bf16.mxu0 %v2668_v1  ;;  %vm1895_vm6 = vmor %vm82_vm1, %vm112_vm13  ;;  %vm85_vm13 = vcmp.eq.s32.totalorder %v55_v38, %v1735_v8  ;;  %v2663_v19 = vand.u32 4294901760, %v2004_v0  ;;  %v2770_v22 = vmov 0 }
  0x40   :  { %v2736_v39 = vsel %vm1895_vm6, 4294967295, %v2735_v39  ;;  %vm1914_vm1 = vmpackc.low %vm1895_vm6, %vm1888_vm10  ;;  %vm2654_vm10 = vcmask 654336   ;;  %v2066_v27 = vand.u32 4294901760, %v205_v11  ;;  %v2071_v29 = vsub.f32 %v1972_v56, %v2664_v3 }
  0x41   :  { %v2738_v41 = vsel %vm1914_vm1, 4294967295, %v2737_v41  ;;  %vm1922_vm5 = vmor %vm83_vm0, %vm113_vm3  ;;  %vm117_vm0 = vcmp.eq.s32.totalorder %v57_v43, %v1737_v9  ;;  %v215_v52 = vsel %vm2654_vm10, %v206_v46, 0  ;;  %v2772_v36 = vmov 0 }
  0x42   :  { %1330 = vmatpush1.bf16.msk.msra.mxu1 %vm1877_vm15, %v2672_v17  ;;  %1447 = vmatpush1.bf16.msk.msra.mxu0 %vm1877_vm15, %v2672_v17  ;;  %2739 = vst [vmem:[#allocation16_spill] sm:$0xff] %v2738_v41  ;;  %vm86_vm15 = vcmp.eq.s32.totalorder %v56_v40, %v1735_v8  ;;  %vm1929_vm6 = vmor %vm84_vm8, %vm114_vm9  ;;  %v1967_v54 = vand.u32 4294901760, %v215_v52  ;;  %v66_v49 = vadd.s32 200, %v1727_v2  ;;  %v2796_v42 = vmov 0 }
  0x43   :  { %1331 = vmatprep.subr.bf16.mxu1 %v2668_v1  ;;  %1448 = vmatprep.subr.bf16.mxu0 %v2668_v1  ;;  %vm1934_vm14 = vmor %vm85_vm13, %vm115_vm12  ;;  %vm87_vm12 = vcmp.eq.s32.totalorder %v57_v43, %v1735_v8  ;;  %vm89_vm13 = vcmp.eq.s32.totalorder %v59_v53, %v1735_v8  ;;  %v2776_v43 = vmov 0  ;;  %v2807_v5 = vmov 1.0|1.0  }
  0x44   :  { %vm1947_vm3 = vmor %vm86_vm15, %vm116_vm2  ;;  %vm88_vm2 = vcmp.eq.s32.totalorder %v58_v45, %v1735_v8  ;;  %vm118_vm15 = vcmp.eq.s32.totalorder %v58_v45, %v1737_v9  ;;  %v2002_v63 = vsub.f32 %v215_v52, %v1967_v54  ;;  %v2116_v45 = vsub.f32 %v2004_v0, %v2663_v19 }
  0x45   :  { %vm1957_vm4 = vmpackc.low %vm1929_vm6, %vm1922_vm5  ;;  %v2129_v52 = vsub.f32 %v205_v11, %v2066_v27  ;;  %v1226_v3 = vsel %vm1934_vm14, 1.0, %v2670_v48 }
  0x46   :  { %1333 = vmatpush1.bf16.msk.msra.mxu1 %vm1914_vm1, %v2672_v17  ;;  %1450 = vmatpush1.bf16.msk.msra.mxu0 %vm1914_vm1, %v2672_v17  ;;  %v2749_v51 = vsel %vm1957_vm4, 4294967295, %v2748_v51  ;;  %vm1978_vm8 = vmpackc.low %vm1947_vm3, %vm1934_vm14  ;;  %2758 = vst [vmem:[#allocation19_spill] sm:$0xff] %v2002_v63  ;;  %v318_v4 = vand.u32 4294901760, %v2002_v63 }
  0x47   :  { %1334 = vmatprep.subr.bf16.mxu1 %v2668_v1  ;;  %1451 = vmatprep.subr.bf16.mxu0 %v2668_v1  ;;  %2750 = vst [vmem:[#allocation17_spill] sm:$0xff] %v2749_v51  ;;  %v2752_v57 = vsel %vm1978_vm8, 4294967295, %v2751_v57  ;;  %vm1989_vm7 = vmor %vm87_vm12, %vm117_vm0  ;;  %vm119_vm12 = vcmp.eq.s32.totalorder %v59_v53, %v1737_v9 }
  0x48   :  { %2753 = vst [vmem:[#allocation18_spill] sm:$0xff] %v2752_v57  ;;  %vm1996_vm9 = vmor %vm88_vm2, %vm118_vm15  ;;  %vm2759_vm15 = vnez %v2709_v20  ;;  %vm92_vm2 = vcmp.eq.s32.totalorder %v62_v62, %v1735_v8  ;;  %v319_v14 = vsub.f32 %v2002_v63, %v318_v4  ;;  %846 = vmatprep.mubr.f32.mxu0 %v318_v4  ;;  %v2058_v20 = vsub.f32 %v1214_v6, %v1214_v6 }
  0x49   :  { %v1215_v7 = vsel %vm2759_vm15, 1.0, %v2670_v48  ;;  %vm2028_vm10 = vmpackc.low %vm1996_vm9, %vm1989_vm7  ;;  %vm121_vm15 = vcmp.eq.s32.totalorder %v61_v60, %v1737_v9  ;;  %2783 = vst [vmem:[#allocation23_spill] sm:$0xff] %v2129_v52  ;;  %v2818_v57 = vand.u32 4294901760, %v2129_v52 }
  0x4a   :  { %1336 = vmatpush1.bf16.msk.msra.mxu1 %vm1957_vm4, %v2672_v17  ;;  %1453 = vmatpush1.bf16.msk.msra.mxu0 %vm1957_vm4, %v2672_v17  ;;  %v2761_v10 = vsel %vm2028_vm10, 4294967295, %v2760_v10  ;;  %vm2040_vm0 = vmor %vm89_vm13, %vm119_vm12  ;;  %vm2766_vm4 = vcmp.eq.s32.totalorder %v60_v58, %v1735_v8  ;;  %vm2769_vm13 = vcmp.eq.s32.totalorder %v61_v60, %v1735_v8  ;;  %v320_v24 = vand.u32 4294901760, %v319_v14 }
  0x4b   :  { %1337 = vmatprep.subr.bf16.mxu1 %v2668_v1  ;;  %1454 = vmatprep.subr.bf16.mxu0 %v2668_v1  ;;  %2762 = vst [vmem:[#allocation20_spill] sm:$0xff] %v2761_v10  ;;  %vm2052_vm1 = vmor %vm2766_vm4, %vm2765_vm11  ;;  %v2073_v34 = vsub.f32 %v1215_v7, %v1215_v7  ;;  %vm2774_vm11 = vnez %v2713_v23  ;;  %v2665_v46 = vand.u32 4294901760, %v2058_v20 }
  0x4c   :  { %v2768_v16 = vsel %vm2052_vm1, 4294967295, %v2767_v16  ;;  %vm2062_vm12 = vmor %vm2769_vm13, %vm121_vm15  ;;  %v1216_v38 = vsel %vm2774_vm11, 1.0, %v2670_v48  ;;  %vm2775_vm15 = vnez %v2715_v25  ;;  %vm123_vm13 = vcmp.eq.s32.totalorder %v63_v13, %v1737_v9  ;;  %321 = vmatprep.mubr.f32.mxu1 %v320_v24  ;;  %v208_v24 = vld [vmem:[#allocation5 + $0x18] sm:$0xff] }
  0x4d   :  { %v2771_v22 = vsel %vm2062_vm12, 4294967295, %v2770_v22  ;;  %v1217_v40 = vsel %vm2775_vm15, 1.0, %v2670_v48  ;;  %vm2779_vm11 = vnez %v2720_v28  ;;  %v65_v25 = vadd.s32 192, %v1727_v2 }
  0x4e   :  { %1339 = vmatpush1.bf16.msk.msra.mxu1 %vm1978_vm8, %v2672_v17  ;;  %1456 = vmatpush1.bf16.msk.msra.mxu0 %vm1978_vm8, %v2672_v17  ;;  %vm122_vm8 = vcmp.eq.s32.totalorder %v62_v62, %v1737_v9  ;;  %v1218_v23 = vsel %vm2779_vm11, 1.0, %v2670_v48  ;;  %v2780_v28 = vmov 0  ;;  %v2667_v53 = vand.u32 4294901760, %v2073_v34 }
  0x4f   :  { %1340 = vmatprep.subr.bf16.mxu1 %v2668_v1  ;;  %1457 = vmatprep.subr.bf16.mxu0 %v2668_v1  ;;  %vm2085_vm4 = vmor %vm92_vm2, %vm122_vm8  ;;  %v2132_v55 = vsub.f32 %v1216_v38, %v1216_v38  ;;  %v2134_v58 = vsub.f32 %v1217_v40, %v1217_v40  ;;  %vm2784_vm11 = vnez %v2722_v30  ;;  %vm2785_vm15 = vcmp.eq.s32.totalorder %v63_v13, %v1735_v8 }
  0x50   :  { %v2773_v36 = vsel %vm2085_vm4, 4294967295, %v2772_v36  ;;  %vm2101_vm8 = vmpackc.low %vm2052_vm1, %vm2040_vm0  ;;  %v1219_v60 = vsel %vm2784_vm11, 1.0, %v2670_v48  ;;  %v2153_v4 = vsub.f32 %v1218_v23, %v1218_v23  ;;  %vm2788_vm11 = vnez %v2727_v32 }
  0x51   :  { %v2777_v43 = vsel %vm2101_vm8, 4294967295, %v2776_v43  ;;  %vm2123_vm2 = vmpackc.low %vm2085_vm4, %vm2062_vm12  ;;  %v1220_v30 = vsel %vm2788_vm11, 1.0, %v2670_v48  ;;  %vm2789_vm4 = vnez %v2729_v33  ;;  %vm2795_vm11 = vnez %v2736_v39 }
  0x52   :  { %1342 = vmatpush1.bf16.msk.msra.mxu1 %vm2028_vm10, %v2672_v17  ;;  %1459 = vmatpush1.bf16.msk.msra.mxu0 %vm2028_vm10, %v2672_v17  ;;  %2778 = vst [vmem:[#allocation21_spill] sm:$0xff] %v2777_v43  ;;  %v2781_v28 = vsel %vm2123_vm2, 4294967295, %v2780_v28  ;;  %vm2149_vm10 = vmor %vm2785_vm15, %vm123_vm13  ;;  %v1221_v6 = vsel %vm2789_vm4, 1.0, %v2670_v48  ;;  %vm2791_vm13 = vcmp.eq.s32.totalorder %v64_v18, %v1737_v9  ;;  %vm2792_vm15 = vcmp.eq.s32.totalorder %v64_v18, %v1735_v8 }
  0x53   :  { %1343 = vmatprep.subr.bf16.mxu1 %v2668_v1  ;;  %1460 = vmatprep.subr.bf16.mxu0 %v2668_v1  ;;  %2782 = vst [vmem:[#allocation22_spill] sm:$0xff] %v2781_v28  ;;  %vm2170_vm12 = vmor %vm2792_vm15, %vm2791_vm13  ;;  %v1223_v32 = vsel %vm2795_vm11, 1.0, %v2670_v48  ;;  %v1224_v33 = vsel %vm1922_vm5, 1.0, %v2670_v48  ;;  %vm95_vm4 = vcmp.eq.s32.totalorder %v65_v25, %v1735_v8  ;;  %vm96_vm1 = vcmp.eq.s32.totalorder %v66_v49, %v1735_v8 }
  0x54   :  { %vm126_vm13 = vcmp.eq.s32.totalorder %v66_v49, %v1737_v9  ;;  %v2666_v13 = vand.u32 4294901760, %v2129_v52  ;;  %v2187_v14 = vsub.f32 %v1220_v30, %v1220_v30  ;;  %v2189_v39 = vsub.f32 %v1221_v6, %v1221_v6  ;;  %vm2203_vm5 = vmpackc.low %vm2170_vm12, %vm2149_vm10 }
  0x55   :  { %v2797_v42 = vsel %vm2203_vm5, 4294967295, %v2796_v42  ;;  %v382_v38 = vand.u32 4294901760, %v2071_v29  ;;  %v389_v40 = vand.u32 4294901760, %v2116_v45  ;;  %v2209_v23 = vsub.f32 %v1223_v32, %v1223_v32  ;;  %vm2232_vm11 = vmor %vm96_vm1, %vm126_vm13 }
  0x56   :  { %1345 = vmatpush1.bf16.msk.msra.mxu1 %vm2101_vm8, %v2672_v17  ;;  %1462 = vmatpush1.bf16.msk.msra.mxu0 %vm2101_vm8, %v2672_v17  ;;  %vm2790_vm8 = vnez %v2734_v37  ;;  %v2182_v37 = vsub.f32 %v1219_v60, %v1219_v60  ;;  %2798 = vst [vmem:[#allocation24_spill] sm:$0xff] %v2797_v42  ;;  %v2211_v60 = vsub.f32 %v1224_v33, %v1224_v33  ;;  %v2676_v29 = vand.u32 4294901760, %v2132_v55 }
  0x57   :  { %v1222_v7 = vsel %vm2790_vm8, 1.0, %v2670_v48  ;;  %1346 = vmatprep.subr.bf16.mxu1 %v2668_v1  ;;  %1463 = vmatprep.subr.bf16.mxu0 %v2668_v1  ;;  %vm125_vm8 = vcmp.eq.s32.totalorder %v65_v25, %v1737_v9  ;;  %v2675_v45 = vand.u32 4294901760, %v2134_v58  ;;  %v1225_v6 = vsel %vm1929_vm6, 1.0, %v2670_v48 }
  0x58   :  { %v2191_v18 = vsub.f32 %v1222_v7, %v1222_v7  ;;  %vm2219_vm15 = vmor %vm95_vm4, %vm125_vm8  ;;  %v395_v25 = vsub.f32 %v2058_v20, %v2665_v46  ;;  %v325_v33 = vsub.f32 %v2129_v52, %v2666_v13  ;;  %v402_v9 = vsub.f32 %v2073_v34, %v2667_v53  ;;  %v210_v13 = vld [vmem:[#allocation5 + $0x28] sm:$0xff]  ;;  %v211_v52 = vld [vmem:[#allocation5 + $0x30] sm:$0xff] }
  0x59   :  { %vm2803_vm6 = vcmask 654336   ;;  %v2259_v32 = vsub.f32 %v1225_v6, %v1225_v6  ;;  %vm2270_vm1 = vmpackc.low %vm2232_vm11, %vm2219_vm15  ;;  %v2804_v46 = vmov 0  ;;  %v2276_v49 = vand.u32 4294901760, %v207_v44 }
  0x5a   :  { %1348 = vmatpush1.bf16.msk.msra.mxu1 %vm2123_vm2, %v2672_v17  ;;  %1465 = vmatpush1.bf16.msk.msra.mxu0 %vm2123_vm2, %v2672_v17  ;;  %v218_v8 = vsel %vm2803_vm6, %v208_v24, 0  ;;  %v2805_v46 = vsel %vm2270_vm1, 4294967295, %v2804_v46  ;;  %v1356_v24 = vpack.c.bf16 %v389_v40, %v382_v38  ;;  %v396_v6 = vand.u32 4294901760, %v395_v25  ;;  %vm2812_vm14 = vmmov %vm2803_vm6 }
  0x5b   :  { %1349 = vmatprep.subr.bf16.mxu1 %v2668_v1  ;;  %1466 = vmatprep.subr.bf16.mxu0 %v2668_v1  ;;  %2806 = vst [vmem:[#allocation25_spill] sm:$0xff] %v2805_v46  ;;  %v2274_v19 = vand.u32 4294901760, %v218_v8  ;;  %v326_v47 = vand.u32 4294901760, %v325_v33  ;;  %v403_v53 = vand.u32 4294901760, %v402_v9  ;;  %v416_v48 = vsub.f32 %v2134_v58, %v2675_v45 }
  0x5c   :  { %v2808_v38 = vand.u32 4294901760, %v1972_v56  ;;  %v2809_v40 = vand.u32 4294901760, %v2004_v0  ;;  %v2298_v9 = vsub.f32 %v207_v44, %v2276_v49  ;;  %v221_v45 = vsel %vm2812_vm14, %v210_v13, 0  ;;  %v212_v13 = vld [vmem:[#allocation5 + $0x38] sm:$0xff] }
  0x5d   :  { %v2295_v33 = vsub.f32 %v218_v8, %v2274_v19  ;;  %v2813_v2 = vmov 0.0   ;;  %v2814_v42 = vmov 0.0|0.0   ;;  %v2816_v8 = vand.u32 4294901760, %v2073_v34 }
  0x5e   :  { %1351 = vmatpush1.bf16.msk.msra.mxu1 %vm2203_vm5, %v2672_v17  ;;  %1468 = vmatpush1.bf16.msk.msra.mxu0 %vm2203_vm5, %v2672_v17  ;;  %v209_v17 = vld [vmem:[#allocation5 + $0x20] sm:$0xff]  ;;  %v1473_v25 = vpack.c.bf16 %v2809_v40, %v2808_v38  ;;  %2811 = vst [vmem:[#allocation27_spill] sm:$0xff] %v2298_v9  ;;  %v1227_v46 = vsel %vm1947_vm3, 1.0, %v2813_v2  ;;  %v2815_v38 = vand.u32 4294901760, %v2058_v20  ;;  %v2817_v44 = vand.u32 4294901760, %v2153_v4  ;;  %vm2821_vm3 = vmmov %vm2803_vm6 }
  0x5f   :  { %1352 = vmatprep.subr.bf16.mxu1 %v2668_v1  ;;  %1469 = vmatprep.subr.bf16.mxu0 %v2668_v1  ;;  %v409_v1 = vsub.f32 %v2132_v55, %v2676_v29  ;;  %2810 = vst [vmem:[#allocation26_spill] sm:$0xff] %v2295_v33  ;;  %v333_v29 = vand.u32 4294901760, %v2295_v33  ;;  %v339_v43 = vand.u32 4294901760, %v2298_v9  ;;  %v2316_v50 = vand.u32 4294901760, %v221_v45 }
  0x60   :  { %v1476_v40 = vpack.c.bf16 %v2816_v8, %v2815_v38  ;;  %v423_v28 = vsub.f32 %v2153_v4, %v2817_v44  ;;  %v2318_v10 = vand.u32 4294901760, %v209_v17  ;;  %v1359_v51 = vpack.c.bf16 %v403_v53, %v396_v6 }
  0x61   :  { %v410_v41 = vand.u32 4294901760, %v409_v1  ;;  %v417_v38 = vand.u32 4294901760, %v416_v48  ;;  %v2819_v8 = vand.u32 4294901760, %v2182_v37  ;;  %v334_v35 = vsub.f32 %v2295_v33, %v333_v29 }
  0x62   :  { %1354 = vmatpush1.bf16.msk.msra.mxu1 %vm2270_vm1, %v2807_v5  ;;  %1471 = vmatpush1.bf16.msk.msra.mxu0 %vm2270_vm1, %v2807_v5  ;;  %v340_v63 = vsub.f32 %v2298_v9, %v339_v43  ;;  %v2328_v31 = vsub.f32 %v221_v45, %v2316_v50  ;;  %v2822_v1 = vand.u32 4294901760, %v2132_v55  ;;  %v2823_v48 = vand.u32 4294901760, %v2134_v58 }
  0x63   :  { %1355 = vmatprep.subr.bf16.mxu1 %v2814_v42  ;;  %1472 = vmatprep.subr.bf16.mxu0 %v2814_v42  ;;  %v430_v44 = vsub.f32 %v2182_v37, %v2819_v8  ;;  %v2340_v6 = vsub.f32 %v209_v17, %v2318_v10  ;;  %v2825_v45 = vand.u32 4294901760, %v2187_v14  ;;  %v1362_v9 = vpack.c.bf16 %v417_v38, %v410_v41 }
  0x64   :  { %2820 = vst [vmem:[#allocation28_spill] sm:$0xff] %v2328_v31  ;;  %v1479_v53 = vpack.c.bf16 %v2823_v48, %v2822_v1  ;;  %v341_v33 = vand.u32 4294901760, %v340_v63  ;;  %v2349_v1 = vand.u32 4294901760, %v211_v52  ;;  %v1228_v41 = vsel %vm1989_vm7, 1.0, %v2813_v2 }
  0x65   :  { %327 = vmatmul.mubr.f32.vlgmr.msra.gmra.mrb[0].mxu1 %v326_v47  ;;  %850 = vmatmul.mubr.f32.vlgmr.msra.gmra.mrb[0].mxu0 %v2818_v57  ;;  %v224_v47 = vsel %vm2821_vm3, %v212_v13, 0  ;;  %v2331_v57 = vsub.f32 %v1226_v3, %v1226_v3  ;;  %2824 = vst [vmem:[#allocation29_spill] sm:$0xff] %v2340_v6  ;;  %v335_v13 = vand.u32 4294901760, %v334_v35  ;;  %v348_v3 = vand.u32 4294901760, %v2328_v31 }
  0x66   :  { %1357 = vmatpush1.bf16.msra.mxu1 %v1356_v24  ;;  %1474 = vmatpush1.bf16.msra.mxu0 %v1473_v25  ;;  %v424_v24 = vand.u32 4294901760, %v423_v28  ;;  %v437_v25 = vsub.f32 %v2187_v14, %v2825_v45  ;;  %v2346_v8 = vand.u32 4294901760, %v224_v47  ;;  %v354_v26 = vand.u32 4294901760, %v2340_v6  ;;  %2826 = vst [vmem:[#allocation30_spill] sm:$0xff] %v2349_v1 }
  0x67   :  { %1358 = vmatprep.subr.bf16.mxu1 %v2814_v42  ;;  %1475 = vmatprep.subr.bf16.mxu0 %v2814_v42  ;;  %v431_v17 = vand.u32 4294901760, %v430_v44  ;;  %v2827_v28 = vand.u32 4294901760, %v2189_v39  ;;  %v349_v35 = vsub.f32 %v2328_v31, %v348_v3  ;;  %v2358_v45 = vsub.f32 %v1227_v46, %v1227_v46 }
  0x68   :  { %857 = vmatprep.mubr.f32.mxu0 %v333_v29  ;;  %v2356_v29 = vsub.f32 %v224_v47, %v2346_v8  ;;  %v2367_v63 = vsub.f32 %v211_v52, %v2349_v1  ;;  %v2829_v46 = vand.u32 4294901760, %v2153_v4  ;;  %336 = vmatprep.mubr.f32.mxu1 %v335_v13  ;;  %v438_v47 = vand.u32 4294901760, %v437_v25 }
  0x69   :  { %861 = vmatmul.mubr.f32.gmra.mrb[2].mxu0 %v339_v43  ;;  %v444_v48 = vsub.f32 %v2189_v39, %v2827_v28  ;;  %v1229_v43 = vsel %vm1996_vm9, 1.0, %v2813_v2  ;;  %v350_v59 = vand.u32 4294901760, %v349_v35  ;;  %v2831_v28 = vand.u32 4294901760, %v2191_v18  ;;  %342 = vmatmul.mubr.f32.gmra.mrb[2].mxu1 %v341_v33 }
  0x6a   :  { %1360 = vmatpush1.bf16.msra.mxu1 %v1359_v51  ;;  %1477 = vmatpush1.bf16.msra.mxu0 %v1476_v40  ;;  %v355_v51 = vsub.f32 %v2340_v6, %v354_v26  ;;  %2828 = vst [vmem:[#allocation31_spill] sm:$0xff] %v2367_v63  ;;  %v2830_v40 = vand.u32 4294901760, %v2182_v37  ;;  %v363_v44 = vand.u32 4294901760, %v2356_v29  ;;  %v369_v61 = vand.u32 4294901760, %v2367_v63 }
  0x6b   :  { %1361 = vmatprep.subr.bf16.mxu1 %v2814_v42  ;;  %1478 = vmatprep.subr.bf16.mxu0 %v2814_v42  ;;  %v451_v52 = vsub.f32 %v2191_v18, %v2831_v28  ;;  %v1365_v31 = vpack.c.bf16 %v431_v17, %v424_v24  ;;  %v445_v1 = vand.u32 4294901760, %v444_v48  ;;  %v2832_v13 = vand.u32 4294901760, %v2209_v23 }
  0x6c   :  { %v1482_v38 = vpack.c.bf16 %v2830_v40, %v2829_v46  ;;  %868 = vmatprep.mubr.f32.mxu0 %v348_v3  ;;  %v356_v6 = vand.u32 4294901760, %v355_v51  ;;  %v364_v35 = vsub.f32 %v2356_v29, %v363_v44  ;;  %v478_v25 = vand.u32 4294901760, %v2331_v57  ;;  %351 = vmatprep.mubr.f32.mxu1 %v350_v59 }
  0x6d   :  { %872 = vmatmul.mubr.f32.gmra.mrb[4].mxu0 %v354_v26  ;;  %v458_v3 = vsub.f32 %v2209_v23, %v2832_v13  ;;  %v485_v46 = vand.u32 4294901760, %v2358_v45  ;;  %v370_v26 = vsub.f32 %v2367_v63, %v369_v61  ;;  %v2390_v33 = vsub.f32 %v1228_v41, %v1228_v41 }
  0x6e   :  { %1363 = vmatpush1.bf16.msra.mxu1 %v1362_v9  ;;  %1480 = vmatpush1.bf16.msra.mxu0 %v1479_v53  ;;  %v2392_v9 = vsub.f32 %v1229_v43, %v1229_v43  ;;  %v1230_v53 = vsel %vm2040_vm0, 1.0, %v2813_v2  ;;  %v365_v24 = vand.u32 4294901760, %v364_v35  ;;  %vm2833_vm7 = vnez %v2768_v16 }
  0x6f   :  { %1364 = vmatprep.subr.bf16.mxu1 %v2814_v42  ;;  %1481 = vmatprep.subr.bf16.mxu0 %v2814_v42  ;;  %v1231_v17 = vsel %vm2833_vm7, 1.0, %v2813_v2  ;;  %v2834_v48 = vand.u32 4294901760, %v2187_v14  ;;  %v2835_v51 = vand.u32 4294901760, %v2189_v39  ;;  %v2836_v41 = vand.u32 4294901760, %v2211_v60 }
  0x70   :  { %879 = vmatprep.mubr.f32.mxu0 %v363_v44  ;;  %357 = vmatmul.mubr.f32.gmra.mrb[4].mxu1 %v356_v6  ;;  %v371_v28 = vand.u32 4294901760, %v370_v26  ;;  %v1368_v12 = vpack.c.bf16 %v445_v1, %v438_v47  ;;  %v452_v59 = vand.u32 4294901760, %v451_v52  ;;  %v459_v44 = vand.u32 4294901760, %v458_v3 }
  0x71   :  { %v1485_v40 = vpack.c.bf16 %v2835_v51, %v2834_v48  ;;  %v465_v43 = vsub.f32 %v2211_v60, %v2836_v41  ;;  %883 = vmatmul.mubr.f32.gmra.mrb[6].mxu0 %v369_v61  ;;  %v2837_v16 = vand.u32 4294901760, %v2259_v32  ;;  %v492_v35 = vand.u32 4294901760, %v2390_v33  ;;  %366 = vmatprep.mubr.f32.mxu1 %v365_v24 }
  0x72   :  { %1366 = vmatpush1.bf16.msra.mxu1 %v1365_v31  ;;  %1483 = vmatpush1.bf16.msra.mxu0 %v1482_v38  ;;  %v499_v48 = vand.u32 4294901760, %v2392_v9  ;;  %v2414_v6 = vsub.f32 %v1230_v53, %v1230_v53  ;;  %v2416_v61 = vsub.f32 %v1231_v17, %v1231_v17  ;;  %vm2838_vm9 = vnez %v2771_v22 }
  0x73   :  { %v472_v13 = vsub.f32 %v2259_v32, %v2837_v16  ;;  %1367 = vmatprep.subr.bf16.mxu1 %v2814_v42  ;;  %1484 = vmatprep.subr.bf16.mxu0 %v2814_v42  ;;  %v1232_v31 = vsel %vm2838_vm9, 1.0, %v2813_v2  ;;  %vm2839_vm0 = vnez %v2773_v36  ;;  %v2840_v38 = vand.u32 4294901760, %v2191_v18 }
  0x74   :  { %1031 = vmatprep.mubr.f32.mxu0 %v1967_v54  ;;  %v1233_v1 = vsel %vm2839_vm0, 1.0, %v2813_v2  ;;  %v2841_v47 = vand.u32 4294901760, %v2209_v23  ;;  %v466_v3 = vand.u32 4294901760, %v465_v43  ;;  %372 = vmatmul.mubr.f32.gmra.mrb[6].mxu1 %v371_v28  ;;  %v1371_v26 = vpack.c.bf16 %v459_v44, %v452_v59 }
  0x75   :  { %v473_v53 = vand.u32 4294901760, %v472_v13  ;;  %v479_v22 = vsub.f32 %v2331_v57, %v478_v25  ;;  %v486_v36 = vsub.f32 %v2358_v45, %v485_v46  ;;  %v506_v24 = vand.u32 4294901760, %v2414_v6  ;;  %572 = vmatprep.mubr.f32.mxu1 %v1967_v54 }
  0x76   :  { %v1488_v52 = vpack.c.bf16 %v2841_v47, %v2840_v38  ;;  %1369 = vmatpush1.bf16.msra.mxu1 %v1368_v12  ;;  %1486 = vmatpush1.bf16.msra.mxu0 %v1485_v40  ;;  %v513_v17 = vand.u32 4294901760, %v2416_v61  ;;  %v2439_v51 = vsub.f32 %v1232_v31, %v1232_v31  ;;  %v2441_v40 = vsub.f32 %v1233_v1, %v1233_v1 }
  0x77   :  { %1370 = vmatprep.subr.bf16.mxu1 %v2814_v42  ;;  %1487 = vmatprep.subr.bf16.mxu0 %v2814_v42  ;;  %v1234_v41 = vsel %vm2149_vm10, 1.0, %v2813_v2  ;;  %v1235_v43 = vsel %vm2170_vm12, 1.0, %v2813_v2  ;;  %v2842_v28 = vand.u32 4294901760, %v2211_v60  ;;  %v2843_v12 = vmov %v2837_v16 }
  0x78   :  { %v493_v44 = vsub.f32 %v2390_v33, %v492_v35  ;;  %v1374_v16 = vpack.c.bf16 %v473_v53, %v466_v3  ;;  %v480_v13 = vand.u32 4294901760, %v479_v22  ;;  %v487_v31 = vand.u32 4294901760, %v486_v36 }
  0x79   :  { %v1491_v59 = vpack.c.bf16 %v2843_v12, %v2842_v28  ;;  %v500_v1 = vsub.f32 %v2392_v9, %v499_v48  ;;  %v520_v62 = vand.u32 4294901760, %v2439_v51  ;;  %v527_v11 = vand.u32 4294901760, %v2441_v40 }
  0x7a   :  { %1372 = vmatpush1.bf16.msra.mxu1 %v1371_v26  ;;  %1489 = vmatpush1.bf16.msra.mxu0 %v1488_v52  ;;  %v2460_v38 = vsub.f32 %v1234_v41, %v1234_v41  ;;  %v2462_v47 = vsub.f32 %v1235_v43, %v1235_v43  ;;  %v1236_v52 = vsel %vm2219_vm15, 1.0, %v2813_v2  ;;  %v1237_v3 = vsel %vm2232_vm11, 1.0, %v2813_v2 }
  0x7b   :  { %1373 = vmatprep.subr.bf16.mxu1 %v2814_v42  ;;  %1490 = vmatprep.subr.bf16.mxu0 %v2814_v42  ;;  %v1494_v26 = vpack.c.bf16 %v485_v46, %v478_v25  ;;  %v494_v53 = vand.u32 4294901760, %v493_v44  ;;  %v1377_v22 = vpack.c.bf16 %v487_v31, %v480_v13  ;;  %v501_v36 = vand.u32 4294901760, %v500_v1 }
  0x7c   :  { %v507_v41 = vsub.f32 %v2414_v6, %v506_v24  ;;  %v514_v43 = vsub.f32 %v2416_v61, %v513_v17  ;;  %v534_v2 = vand.u32 4294901760, %v2460_v38  ;;  %v541_v30 = vand.u32 4294901760, %v2462_v47 }
  0x7d   :  { %v2480_v7 = vsub.f32 %v1236_v52, %v1236_v52  ;;  %v2482_v25 = vsub.f32 %v1237_v3, %v1237_v3  ;;  %v521_v46 = vsub.f32 %v2439_v51, %v520_v62  ;;  %v528_v28 = vsub.f32 %v2441_v40, %v527_v11 }
  0x7e   :  { %1375 = vmatpush1.bf16.msra.mxu1 %v1374_v16  ;;  %1492 = vmatpush1.bf16.msra.mxu0 %v1491_v59  ;;  %v1380_v12 = vpack.c.bf16 %v501_v36, %v494_v53  ;;  %v1497_v59 = vpack.c.bf16 %v499_v48, %v492_v35  ;;  %v508_v44 = vand.u32 4294901760, %v507_v41  ;;  %v515_v16 = vand.u32 4294901760, %v514_v43 }
  0x7f   :  { %1376 = vmatprep.subr.bf16.mxu1 %v2814_v42  ;;  %1493 = vmatprep.subr.bf16.mxu0 %v2814_v42  ;;  %v548_v13 = vand.u32 4294901760, %v2480_v7  ;;  %v1500_v31 = vpack.c.bf16 %v513_v17, %v506_v24  ;;  %v522_v1 = vand.u32 4294901760, %v521_v46  ;;  %v529_v52 = vand.u32 4294901760, %v528_v28 }
  0x80   :  { %v555_v3 = vand.u32 4294901760, %v2482_v25  ;;  %v1383_v63 = vpack.c.bf16 %v515_v16, %v508_v44  ;;  %v542_v35 = vsub.f32 %v2462_v47, %v541_v30  ;;  %v1503_v53 = vpack.c.bf16 %v527_v11, %v520_v62 }
  0x81   :  { %v1386_v48 = vpack.c.bf16 %v529_v52, %v522_v1  ;;  %v1506_v43 = vpack.c.bf16 %v541_v30, %v534_v2  ;;  %v1395_v11 = vpack.c.bf16 %v2004_v0, %v1972_v56  ;;  %vm2844_vm10 = vnez %v2705_v15  ;;  %v2846_v56 = vld [vmem:[#allocation13_spill] sm:$0xff]  ;;  %v2848_v0 = vld [vmem:[#allocation30_spill] sm:$0xff]  ;;  %v2870_v30 = vld [vmem:[#allocation28_spill] sm:$0xff] }
  0x82   :  { %1378 = vmatpush1.bf16.msra.mxu1 %v1377_v22  ;;  %1495 = vmatpush1.bf16.msra.mxu0 %v1494_v26  ;;  %v535_v26 = vsub.f32 %v2460_v38, %v534_v2  ;;  %v543_v17 = vand.u32 4294901760, %v542_v35  ;;  %v549_v22 = vsub.f32 %v2480_v7, %v548_v13  ;;  %v556_v36 = vsub.f32 %v2482_v25, %v555_v3 }
  0x83   :  { %1379 = vmatprep.subr.bf16.mxu1 %v2814_v42  ;;  %1496 = vmatprep.subr.bf16.mxu0 %v2814_v42  ;;  %v1509_v62 = vpack.c.bf16 %v555_v3, %v548_v13  ;;  %v1398_v2 = vpack.c.bf16 %v2073_v34, %v2058_v20  ;;  %vm2845_vm12 = vnez %v2711_v21  ;;  %v1401_v15 = vpack.c.bf16 %v2134_v58, %v2132_v55  ;;  %v2849_v20 = vld [vmem:[#allocation14_spill] sm:$0xff]  ;;  %v2851_v55 = vld [vmem:[#allocation19_spill] sm:$0xff]  ;;  %v2874_v13 = vld [vmem:[#allocation12_spill] sm:$0xff] }
  0x84   :  { %v536_v24 = vand.u32 4294901760, %v535_v26  ;;  %v550_v46 = vand.u32 4294901760, %v549_v22  ;;  %v557_v28 = vand.u32 4294901760, %v556_v36  ;;  %vm2847_vm4 = vnez %v2846_v56  ;;  %v2852_v58 = vld [vmem:[#allocation15_spill] sm:$0xff] }
  0x85   :  { %v1404_v21 = vpack.c.bf16 %v2182_v37, %v2153_v4  ;;  %vm2850_vm8 = vnez %v2849_v20  ;;  %v1407_v34 = vpack.c.bf16 %v2189_v39, %v2187_v14  ;;  %vm2853_vm13 = vnez %v2852_v58  ;;  %v2854_v37 = vld [vmem:[#allocation16_spill] sm:$0xff]  ;;  %v2856_v14 = vld [vmem:[#allocation17_spill] sm:$0xff] }
  0x86   :  { %1381 = vmatpush1.bf16.msra.mxu1 %v1380_v12  ;;  %1498 = vmatpush1.bf16.msra.mxu0 %v1497_v59  ;;  %v1389_v41 = vpack.c.bf16 %v543_v17, %v536_v24  ;;  %v1410_v4 = vpack.c.bf16 %v2209_v23, %v2191_v18  ;;  %vm2855_vm15 = vnez %v2854_v37  ;;  %vm2857_vm11 = vnez %v2856_v14  ;;  %v2858_v18 = vld [vmem:[#allocation18_spill] sm:$0xff] }
  0x87   :  { %1382 = vmatprep.subr.bf16.mxu1 %v2814_v42  ;;  %1499 = vmatprep.subr.bf16.mxu0 %v2814_v42  ;;  %v1416_v39 = vpack.c.bf16 %v2358_v45, %v2331_v57  ;;  %vm2859_vm6 = vnez %v2858_v18  ;;  %v1419_v23 = vpack.c.bf16 %v2392_v9, %v2390_v33  ;;  %v2862_v57 = vld [vmem:[#allocation21_spill] sm:$0xff]  ;;  %v1425_v45 = vpack.c.bf16 %v2441_v40, %v2439_v51  ;;  %v2867_v40 = vld [vmem:[#allocation23_spill] sm:$0xff] }
  0x88   :  { %vm2863_vm3 = vnez %v2862_v57  ;;  %v1428_v9 = vpack.c.bf16 %v2462_v47, %v2460_v38  ;;  %v2868_v38 = vld [vmem:[#allocation26_spill] sm:$0xff]  ;;  %v2869_v47 = vld [vmem:[#allocation27_spill] sm:$0xff] }
  0x8a   :  { %1384 = vmatpush1.bf16.msra.mxu1 %v1383_v63  ;;  %1501 = vmatpush1.bf16.msra.mxu0 %v1500_v31  ;;  %v1392_v63 = vpack.c.bf16 %v557_v28, %v550_v46 }
  0x8b   :  { %1385 = vmatprep.subr.bf16.mxu1 %v2814_v42  ;;  %1502 = vmatprep.subr.bf16.mxu0 %v2814_v42 }
  0x8e   :  { %1387 = vmatpush1.bf16.msra.mxu1 %v1386_v48  ;;  %1504 = vmatpush1.bf16.msra.mxu0 %v1503_v53 }
  0x8f   :  { %1388 = vmatprep.subr.bf16.mxu1 %v2814_v42  ;;  %1505 = vmatprep.subr.bf16.mxu0 %v2814_v42 }
  0x92   :  { %1390 = vmatpush1.bf16.msra.mxu1 %v1389_v41  ;;  %1507 = vmatpush1.bf16.msra.mxu0 %v1506_v43 }
  0x93   :  { %1391 = vmatprep.subr.bf16.mxu1 %v2814_v42  ;;  %1508 = vmatprep.subr.bf16.mxu0 %v2814_v42 }
  0x96   :  { %1393 = vmatpush1.bf16.msra.mxu1 %v1392_v63  ;;  %1510 = vmatpush1.bf16.msra.mxu0 %v1509_v62 }
  0x97   :  { %1394 = vmatprep.subr.bf16.mxu1 %v2814_v42  ;;  %1511 = vmatprep.subr.bf16.mxu0 %v2814_v42 }
  0x99   :  { %574 = vmatmul.mubr.f32.vlgmr.msra.gmra.mrb[0].mxu1 %v2066_v27  ;;  %1033 = vmatmul.mubr.f32.vlgmr.msra.gmra.mrb[0].mxu0 %v2066_v27 }
  0x9a   :  { %1396 = vmatpush1.bf16.msra.mxu1 %v1395_v11  ;;  %1513 = vmatpush1.bf16.msk.msra.mxu0 %vm2844_vm10, %v2807_v5 }
  0x9b   :  { %1397 = vmatprep.subr.bf16.mxu1 %v2814_v42  ;;  %1514 = vmatprep.subr.bf16.mxu0 %v2814_v42 }
  0x9c   :  { %579 = vmatprep.mubr.f32.mxu1 %v2274_v19  ;;  %1038 = vmatprep.mubr.f32.mxu0 %v2274_v19 }
  0x9d   :  { %581 = vmatmul.mubr.f32.gmra.mrb[2].mxu1 %v2276_v49  ;;  %1040 = vmatmul.mubr.f32.gmra.mrb[2].mxu0 %v2276_v49 }
  0x9e   :  { %1399 = vmatpush1.bf16.msra.mxu1 %v1398_v2  ;;  %1516 = vmatpush1.bf16.msk.msra.mxu0 %vm2845_vm12, %v2807_v5 }
  0x9f   :  { %1400 = vmatprep.subr.bf16.mxu1 %v2814_v42  ;;  %1517 = vmatprep.subr.bf16.mxu0 %v2814_v42 }
  0xa0   :  { %586 = vmatprep.mubr.f32.mxu1 %v2316_v50  ;;  %1045 = vmatprep.mubr.f32.mxu0 %v2316_v50 }
  0xa1   :  { %588 = vmatmul.mubr.f32.gmra.mrb[4].mxu1 %v2318_v10  ;;  %1047 = vmatmul.mubr.f32.gmra.mrb[4].mxu0 %v2318_v10 }
  0xa2   :  { %1402 = vmatpush1.bf16.msra.mxu1 %v1401_v15  ;;  %1519 = vmatpush1.bf16.msk.msra.mxu0 %vm2847_vm4, %v2807_v5 }
  0xa3   :  { %1403 = vmatprep.subr.bf16.mxu1 %v2814_v42  ;;  %1520 = vmatprep.subr.bf16.mxu0 %v2814_v42 }
  0xa4   :  { %593 = vmatprep.mubr.f32.mxu1 %v2346_v8  ;;  %1052 = vmatprep.mubr.f32.mxu0 %v2346_v8 }
  0xa5   :  { %595 = vmatmul.mubr.f32.gmra.mrb[6].mxu1 %v2848_v0  ;;  %1054 = vmatmul.mubr.f32.gmra.mrb[6].mxu0 %v2848_v0 }
  0xa6   :  { %1405 = vmatpush1.bf16.msra.mxu1 %v1404_v21  ;;  %1522 = vmatpush1.bf16.msk.msra.mxu0 %vm2850_vm8, %v2807_v5 }
  0xa7   :  { %1406 = vmatprep.subr.bf16.mxu1 %v2814_v42  ;;  %1523 = vmatprep.subr.bf16.mxu0 %v2814_v42 }
  0xa8   :  { %718 = vmatprep.mubr.f32.mxu1 %v2851_v55  ;;  %1150 = vmatprep.mubr.f32.mxu0 %v1967_v54  ;;  %v1413_v54 = vpack.c.bf16 %v2259_v32, %v2211_v60  ;;  %v2860_v60 = vld [vmem:[#allocation20_spill] sm:$0xff]  ;;  %v1422_v32 = vpack.c.bf16 %v2416_v61, %v2414_v6  ;;  %v1431_v61 = vpack.c.bf16 %v2482_v25, %v2480_v7 }
  0xa9   :  { %vm2861_vm14 = vnez %v2860_v60 }
  0xaa   :  { %1408 = vmatpush1.bf16.msra.mxu1 %v1407_v34  ;;  %1525 = vmatpush1.bf16.msk.msra.mxu0 %vm2853_vm13, %v2807_v5 }
  0xab   :  { %1409 = vmatprep.subr.bf16.mxu1 %v2814_v42  ;;  %1526 = vmatprep.subr.bf16.mxu0 %v2814_v42 }
  0xae   :  { %1411 = vmatpush1.bf16.msra.mxu1 %v1410_v4  ;;  %1528 = vmatpush1.bf16.msk.msra.mxu0 %vm2855_vm15, %v2807_v5 }
  0xaf   :  { %1412 = vmatprep.subr.bf16.mxu1 %v2814_v42  ;;  %1529 = vmatprep.subr.bf16.mxu0 %v2814_v42 }
  0xb2   :  { %1414 = vmatpush1.bf16.msra.mxu1 %v1413_v54  ;;  %1531 = vmatpush1.bf16.msk.msra.mxu0 %vm2857_vm11, %v2807_v5 }
  0xb3   :  { %1415 = vmatprep.subr.bf16.mxu1 %v2814_v42  ;;  %1532 = vmatprep.subr.bf16.mxu0 %v2814_v42 }
  0xb6   :  { %1417 = vmatpush1.bf16.msra.mxu1 %v1416_v39  ;;  %1534 = vmatpush1.bf16.msk.msra.mxu0 %vm2859_vm6, %v2807_v5 }
  0xb7   :  { %1418 = vmatprep.subr.bf16.mxu1 %v2814_v42  ;;  %1535 = vmatprep.subr.bf16.mxu0 %v2814_v42 }
  0xba   :  { %1420 = vmatpush1.bf16.msra.mxu1 %v1419_v23  ;;  %1537 = vmatpush1.bf16.msk.msra.mxu0 %vm2861_vm14, %v2807_v5 }
  0xbb   :  { %1421 = vmatprep.subr.bf16.mxu1 %v2814_v42  ;;  %1538 = vmatprep.subr.bf16.mxu0 %v2814_v42 }
  0xbe   :  { %1423 = vmatpush1.bf16.msra.mxu1 %v1422_v32  ;;  %1540 = vmatpush1.bf16.msk.msra.mxu0 %vm2863_vm3, %v2807_v5 }
  0xbf   :  { %1424 = vmatprep.subr.bf16.mxu1 %v2814_v42  ;;  %1541 = vmatprep.subr.bf16.mxu0 %v2814_v42 }
  0xc2   :  { %1426 = vmatpush1.bf16.msra.mxu1 %v1425_v45  ;;  %1543 = vmatpush1.bf16.msk.msra.mxu0 %vm2123_vm2, %v2807_v5  ;;  %vm1179_vm2 = vcmp.eq.s32.totalorder %v2874_v13, 15 }
  0xc3   :  { %1427 = vmatprep.subr.bf16.mxu1 %v2814_v42  ;;  %1544 = vmatprep.subr.bf16.mxu0 %v2814_v42 }
  0xc6   :  { %1429 = vmatpush1.bf16.msra.mxu1 %v1428_v9  ;;  %1546 = vmatpush1.bf16.msk.msra.mxu0 %vm2203_vm5, %v2807_v5 }
  0xc7   :  { %1430 = vmatprep.subr.bf16.mxu1 %v2814_v42  ;;  %1547 = vmatprep.subr.bf16.mxu0 %v2814_v42  ;;  %v2871_v42 = vld [vmem:[#allocation29_spill] sm:$0xff] }
  0xca   :  { %1432 = vmatpush1.bf16.msra.mxu1 %v1431_v61  ;;  %1549 = vmatpush1.bf16.msk.msra.mxu0 %vm2270_vm1, %v2807_v5  ;;  %v2872_v5 = vld [vmem:[#allocation31_spill] sm:$0xff] }
  0xcd   :  { %721 = vmatmul.mubr.f32.vlgmr.msra.gmra.mrb[0].mxu1 %v2867_v40  ;;  %1152 = vmatmul.mubr.f32.vlgmr.msra.gmra.mrb[0].mxu0 %v2066_v27 }
  0xce   :  { %727 = vmatprep.mubr.f32.mxu1 %v2868_v38  ;;  %1157 = vmatprep.mubr.f32.mxu0 %v2274_v19  ;;  %v2873_v19 = vld [vmem:[#allocation11_spill] sm:$0xff] }
  0xcf   :  { %v1184_v27 = vsub.s32 2, %v2873_v19 }
  0xd1   :  { %730 = vmatmul.mubr.f32.gmra.mrb[2].mxu1 %v2869_v47  ;;  %1159 = vmatmul.mubr.f32.gmra.mrb[2].mxu0 %v2276_v49 }
  0xd2   :  { %736 = vmatprep.mubr.f32.mxu1 %v2870_v30  ;;  %1164 = vmatprep.mubr.f32.mxu0 %v2316_v50  ;;  %v1596_v50 = vld [vmem:[#allocation2] sm:$0xff] }
  0xd3   :  { %v1185_v44 = vrot.slane %v1596_v50, %v1184_v27 }
  0xd5   :  { %739 = vmatmul.mubr.f32.gmra.mrb[4].mxu1 %v2871_v42  ;;  %1166 = vmatmul.mubr.f32.gmra.mrb[4].mxu0 %v2318_v10 }
  0xd6   :  { %745 = vmatprep.mubr.f32.mxu1 %v2356_v29  ;;  %1171 = vmatprep.mubr.f32.mxu0 %v2346_v8 }
  0xd9   :  { %748 = vmatmul.mubr.f32.gmra.mrb[6].mxu1 %v2872_v5  ;;  %1173 = vmatmul.mubr.f32.gmra.mrb[6].mxu0 %v2848_v0 }
 0x1a0   :  { %v722_v7 = vpop.f32.mrb[0].mxu1  ;;  %v1153_v49 = vpop.f32.mrb[0].mxu0 }
 0x1a1   :  { %v1550_v25 = vadd.f32 %v1153_v49, %v722_v7  ;;  %v724_v12 = vpop.f32.mrb[1].mxu1  ;;  %v1155_v59 = vpop.f32.mrb[1].mxu0 }
 0x1a3   :  { %1190 = vst [vmem:[#allocation7] sm:$0xff] %v1550_v25 }
 0x1a4   :  { %v731_v16 = vpop.f32.mrb[2].mxu1  ;;  %v1160_v10 = vpop.f32.mrb[2].mxu0 }
 0x1a5   :  { %v1551_v29 = vadd.f32 %v1160_v10, %v731_v16  ;;  %v733_v8 = vpop.f32.mrb[3].mxu1  ;;  %v1162_v31 = vpop.f32.mrb[3].mxu0 }
 0x1a7   :  { %v1187_v1 = vsel %vm1179_vm2, %v1185_v44, %v1551_v29 }
 0x1a8   :  { %1191 = vst [vmem:[#allocation7 + $0x8] sm:$0xff] %v1187_v1  ;;  %v740_v52 = vpop.f32.mrb[4].mxu1  ;;  %v1167_v3 = vpop.f32.mrb[4].mxu0 }
 0x1a9   :  { %v1552_v26 = vadd.f32 %v1167_v3, %v740_v52  ;;  %v742_v35 = vpop.f32.mrb[5].mxu1  ;;  %v1169_v48 = vpop.f32.mrb[5].mxu0 }
 0x1ab   :  { %1192 = vst [vmem:[#allocation7 + $0x10] sm:$0xff] %v1552_v26 }
 0x1ac   :  { %v749_v53 = vpop.f32.mrb[6].mxu1  ;;  %v1174_v24 = vpop.f32.mrb[6].mxu0 }
 0x1ad   :  { %v1553_v17 = vadd.f32 %v1174_v24, %v749_v53  ;;  %v751_v22 = vpop.f32.mrb[7].mxu1  ;;  %v1176_v36 = vpop.f32.mrb[7].mxu0 }
 0x1af   :  { %1193 = vst [vmem:[#allocation7 + $0x18] sm:$0xff] %v1553_v17 }
 0x1b0   :  { %1652 = shalt.err (!%p1649_p6)
}
 0x1b1   :  { %s1653_s10 = scalar_lea.hbm %s2639_s2, 512 }
 0x1b2   :  { %p1654_p7 = scmp.ne.s32.totalorder %s2639_s2, %s1653_s10  ;;  %p1657_p8 = scmp.lt.u32.totalorder %s1653_s10, %s2639_s2 }
 0x1b4   :  { %p1659_p9 = pnand %p1657_p8, %p1654_p7 }
 0x1b6   :  { %1662 = shalt.err (!%p1659_p9)
}
 0x1b7   :  { %s1677_s15 = smov 128   ;;  %s1678_s16 = smov 8  }
 0x1b8   :  { %1205 = dma.vmem_to_hbm [thread:$0]  %s1200_s6, 512, %s2639_s2, [#allocation4], %s1677_s15, %s1677_s15, %s1678_s16  }
 0x1b9   :  { %1667 = dma.done.wait [#allocation4], 512  }
 0x1ba   :  { %1668 = vsyncadd [#allocation4], 4294966784 }
 0x1bb   :  { %1209 = vsyncpa [#allocation3], 1 }
 0x1bc   :  { %1210 = vsyncpa [#allocation6], 1 }
 0x1bd   :  { %1211 = vsyncpa [#allocation4], 1 }

</bundles_post_ra>
